<compile_context>
chip_gen: v6e
topology: v6e:2x2x1
jax: 0.10.0
libtpu: 0.0.40
codegen_flags: <defaults>
</compile_context>

<pallas_src>
import functools

import jax
import jax.numpy as jnp
from jax.experimental import pallas as pl
from jax.experimental.pallas import tpu as pltpu


def _conv_bn_relu_kernel(x_ref, w_ref, gamma_ref, beta_ref, mask_ref, out_ref, *,
                         wp, m_valid, inv_cnt, eps):
    """One output-channel block: full 3x3 conv + BatchNorm (batch stats) + ReLU.

    x_ref    : VMEM (C_in, M + 2*Wp + 2)  replication-padded input, spatial flattened
                                          onto the lane axis (shared across grid)
    w_ref    : VMEM (9, C_blk, C_in)      per-tap (C_blk x C_in) weight matrices
    gamma_ref: VMEM (C_blk, 1)            BN scale
    beta_ref : VMEM (C_blk, 1)            BN shift
    mask_ref : VMEM (1, M)                1.0 where the flattened position maps to a
                                          real output pixel, else 0.0
    out_ref  : VMEM (C_blk, M)            conv+BN+ReLU result (invalid columns are
                                          sliced off by the caller)
    """
    mask = mask_ref[...]

    # 3x3 conv over all input channels: 9 tap matmuls on the MXU, f32 accumulation.
    acc = None
    for kh in range(3):
        for kw in range(3):
            lane_shift = kh * wp + kw                       # static lane offset
            patch = x_ref[:, pl.ds(lane_shift, m_valid)]    # (C_in, M)
            w_tap = w_ref[kh * 3 + kw]                      # (C_blk, C_in)
            part = jnp.dot(w_tap, patch, preferred_element_type=jnp.float32)
            acc = part if acc is None else acc + part

    # BatchNorm2d (training mode: batch statistics, biased variance), one pass.
    acc_m = acc * mask
    s1 = jnp.sum(acc_m, axis=1, keepdims=True)              # (C_blk, 1)
    s2 = jnp.sum(acc_m * acc, axis=1, keepdims=True)        # sum of x^2 over valid
    mean = s1 * inv_cnt
    var = s2 * inv_cnt - mean * mean
    scale = jax.lax.rsqrt(var + eps) * gamma_ref[...]
    offset = beta_ref[...] - mean * scale

    # Affine + ReLU, written directly into the output block.
    out_ref[...] = jnp.maximum(acc * scale + offset, 0.0).astype(out_ref.dtype)


def conv_bn_relu(x, weight, gamma, beta, *, eps=1e-5):
    """x: (N, C_in, H, W); weight: (C_out, C_in, 3, 3); gamma/beta: (C_out,)."""
    n, c_in, h, w = x.shape
    c_out = weight.shape[0]
    assert weight.shape == (c_out, c_in, 3, 3)

    # ReplicationPad2d(1) — wrapper-side glue (see TODO above).
    xpad = jnp.pad(x, ((0, 0), (0, 0), (1, 1), (1, 1)), mode="edge")
    hp, wp = h + 2, w + 2
    h_out, w_out = h, w                       # k=3, stride=1, pad=1
    m = n * hp * wp                           # flattened lane-dense length
    ext = 2 * wp + 2                          # maximum tap shift

    # Lane-dense layout: channels on sublanes, flattened (N, Hp, Wp) on lanes.
    x_flat = jnp.transpose(xpad, (1, 0, 2, 3)).reshape(c_in, m)
    x_ext = jnp.pad(x_flat, ((0, 0), (0, ext)))   # zeros only reachable from masked cols

    # Validity mask for flattened padded positions (row < H_out and col < W_out).
    pos = jnp.arange(m, dtype=jnp.int32)
    rem = pos % (hp * wp)
    valid = ((rem // wp) < h_out) & ((rem % wp) < w_out)
    mask = valid.astype(jnp.float32).reshape(1, m)

    # Weights as 9 per-tap (C_out, C_in) matrices; match input dtype for the MXU.
    w_taps = jnp.transpose(weight, (2, 3, 0, 1)).reshape(9, c_out, c_in).astype(x.dtype)
    gamma2 = gamma.astype(jnp.float32).reshape(c_out, 1)
    beta2 = beta.astype(jnp.float32).reshape(c_out, 1)

    # Channel block: fill the f32 sublane dimension when possible.
    c_blk = 8 if (c_out % 8 == 0) else c_out
    grid = (c_out // c_blk,)

    kern = functools.partial(
        _conv_bn_relu_kernel,
        wp=wp, m_valid=m, inv_cnt=1.0 / float(n * h_out * w_out), eps=float(eps))

    out_flat = pl.pallas_call(
        kern,
        out_shape=jax.ShapeDtypeStruct((c_out, m), x.dtype),
        grid=grid,
        in_specs=[
            pl.BlockSpec((c_in, m + ext), lambda c: (0, 0)),     # shared, stays resident
            pl.BlockSpec((9, c_blk, c_in), lambda c: (0, c, 0)),
            pl.BlockSpec((c_blk, 1), lambda c: (c, 0)),
            pl.BlockSpec((c_blk, 1), lambda c: (c, 0)),
            pl.BlockSpec((1, m), lambda c: (0, 0)),
        ],
        out_specs=pl.BlockSpec((c_blk, m), lambda c: (c, 0)),
        compiler_params=pltpu.CompilerParams(
            dimension_semantics=("parallel",),
            vmem_limit_bytes=32 * 1024 * 1024),
    )(x_ext, w_taps, gamma2, beta2, mask)

    # Back to NCHW: drop padded/invalid rows & cols, channels-major -> batch-major.
    out = out_flat.reshape(c_out, n, hp, wp)[:, :, :h_out, :w_out]
    return jnp.transpose(out, (1, 0, 2, 3))


def _reference(x, weight, gamma, beta, *, eps=1e-5):
    """Pure-JAX reference mirroring the PyTorch forward (training-mode BN)."""
    xpad = jnp.pad(x, ((0, 0), (0, 0), (1, 1), (1, 1)), mode="edge")
    y = jax.lax.conv_general_dilated(
        xpad.astype(jnp.float32), weight.astype(jnp.float32),
        window_strides=(1, 1), padding="VALID",
        dimension_numbers=("NCHW", "OIHW", "NCHW"),
        precision=jax.lax.Precision.HIGHEST)
    mean = jnp.mean(y, axis=(0, 2, 3), keepdims=True)
    var = jnp.mean(jnp.square(y - mean), axis=(0, 2, 3), keepdims=True)
    yn = (y - mean) * jax.lax.rsqrt(var + eps)
    yn = yn * gamma.reshape(1, -1, 1, 1) + beta.reshape(1, -1, 1, 1)
    return jnp.maximum(yn, 0.0)


if __name__ == "__main__":
    # Small shapes consistent with the module: Conv(ch_in=4, ch_out=8), 16x16 images.
    N, C_IN, C_OUT, H, W = 2, 4, 8, 16, 16

    key = jax.random.PRNGKey(0)
    kx, kw, kg, kb = jax.random.split(key, 4)

    x = jax.random.normal(kx, (N, C_IN, H, W), dtype=jnp.float32)
    # Conv2d(bias=False) weight: (C_out, C_in, 3, 3).
    weight = jax.random.normal(kw, (C_OUT, C_IN, 3, 3), dtype=jnp.float32) * 0.2
    # BatchNorm2d affine params (deterministic, non-trivial).
    gamma = 1.0 + 0.1 * jax.random.normal(kg, (C_OUT,), dtype=jnp.float32)
    beta = 0.1 * jax.random.normal(kb, (C_OUT,), dtype=jnp.float32)

    out = conv_bn_relu(x, weight, gamma, beta)
    out = jax.block_until_ready(out)

    ref = _reference(x, weight, gamma, beta)
    assert out.shape == (N, C_OUT, H, W), out.shape
    # Loose-ish tolerance accommodates MXU multi-pass f32 matmul precision and the
    # one-pass variance; real structural errors would be O(0.1) or larger.
    err = float(jnp.max(jnp.abs(out - ref)))
    assert err < 3e-2, err

    print("KERNEL_OK")
</pallas_src>

<mosaic_0001>
module attributes {stable_mosaic.version = 11 : i64} {
  func.func @_conv_bn_relu_kernel(%arg0: i32, %arg1: memref<4x686xf32, #tpu.memory_space<vmem>>, %arg2: memref<9x8x4xf32, #tpu.memory_space<vmem>>, %arg3: memref<8x1xf32, #tpu.memory_space<vmem>>, %arg4: memref<8x1xf32, #tpu.memory_space<vmem>>, %arg5: memref<1x648xf32, #tpu.memory_space<vmem>>, %arg6: memref<8x648xf32, #tpu.memory_space<vmem>>) attributes {dimension_semantics = [#tpu.dimension_semantics<parallel>], iteration_bounds = array<i64: 1>, scalar_prefetch = 0 : i64, scratch_operands = 0 : i64, tpu.core_type = #tpu.core_type<tc>, window_params = [{pipeline_mode = #tpu.pipeline_mode<synchronous>, transform_indices = @transform_0, window_bounds = array<i64: 4, 686>}, {transform_indices = @transform_1, window_bounds = array<i64: 9, 8, 4>}, {transform_indices = @transform_2, window_bounds = array<i64: 8, 1>}, {transform_indices = @transform_3, window_bounds = array<i64: 8, 1>}, {pipeline_mode = #tpu.pipeline_mode<synchronous>, transform_indices = @transform_4, window_bounds = array<i64: 1, 648>}, {transform_indices = @transform_5, window_bounds = array<i64: 8, 648>}]} {
    %c0 = arith.constant 0 : index
    %c0_0 = arith.constant 0 : index
    %0 = vector.load %arg5[%c0, %c0_0] : memref<1x648xf32, #tpu.memory_space<vmem>>, vector<1x648xf32>
    %c0_1 = arith.constant 0 : index
    %c0_2 = arith.constant 0 : index
    %1 = vector.load %arg1[%c0_1, %c0_2] : memref<4x686xf32, #tpu.memory_space<vmem>>, vector<4x648xf32>
    %c0_3 = arith.constant 0 : index
    %c0_4 = arith.constant 0 : index
    %c0_5 = arith.constant 0 : index
    %2 = vector.load %arg2[%c0_3, %c0_4, %c0_5] : memref<9x8x4xf32, #tpu.memory_space<vmem>>, vector<1x8x4xf32>
    %3 = vector.shape_cast %2 : vector<1x8x4xf32> to vector<8x4xf32>
    %cst = arith.constant dense<0.000000e+00> : vector<8x648xf32>
    %4 = tpu.matmul %3, %1, %cst {dimension_numbers = #tpu.dot_dimension_numbers<[1], [0], [0], [1], [0, 0, 1, 1], [], []>} : vector<8x4xf32>, vector<4x648xf32>, vector<8x648xf32> -> vector<8x648xf32>
    %c0_6 = arith.constant 0 : index
    %c1 = arith.constant 1 : index
    %5 = vector.load %arg1[%c0_6, %c1] : memref<4x686xf32, #tpu.memory_space<vmem>>, vector<4x648xf32>
    %c1_7 = arith.constant 1 : index
    %c0_8 = arith.constant 0 : index
    %c0_9 = arith.constant 0 : index
    %6 = vector.load %arg2[%c1_7, %c0_8, %c0_9] : memref<9x8x4xf32, #tpu.memory_space<vmem>>, vector<1x8x4xf32>
    %7 = vector.shape_cast %6 : vector<1x8x4xf32> to vector<8x4xf32>
    %cst_10 = arith.constant dense<0.000000e+00> : vector<8x648xf32>
    %8 = tpu.matmul %7, %5, %cst_10 {dimension_numbers = #tpu.dot_dimension_numbers<[1], [0], [0], [1], [0, 0, 1, 1], [], []>} : vector<8x4xf32>, vector<4x648xf32>, vector<8x648xf32> -> vector<8x648xf32>
    %9 = arith.addf %4, %8 : vector<8x648xf32>
    %c0_11 = arith.constant 0 : index
    %c2 = arith.constant 2 : index
    %10 = vector.load %arg1[%c0_11, %c2] : memref<4x686xf32, #tpu.memory_space<vmem>>, vector<4x648xf32>
    %c2_12 = arith.constant 2 : index
    %c0_13 = arith.constant 0 : index
    %c0_14 = arith.constant 0 : index
    %11 = vector.load %arg2[%c2_12, %c0_13, %c0_14] : memref<9x8x4xf32, #tpu.memory_space<vmem>>, vector<1x8x4xf32>
    %12 = vector.shape_cast %11 : vector<1x8x4xf32> to vector<8x4xf32>
    %cst_15 = arith.constant dense<0.000000e+00> : vector<8x648xf32>
    %13 = tpu.matmul %12, %10, %cst_15 {dimension_numbers = #tpu.dot_dimension_numbers<[1], [0], [0], [1], [0, 0, 1, 1], [], []>} : vector<8x4xf32>, vector<4x648xf32>, vector<8x648xf32> -> vector<8x648xf32>
    %14 = arith.addf %9, %13 : vector<8x648xf32>
    %c0_16 = arith.constant 0 : index
    %c18 = arith.constant 18 : index
    %15 = vector.load %arg1[%c0_16, %c18] : memref<4x686xf32, #tpu.memory_space<vmem>>, vector<4x648xf32>
    %c3 = arith.constant 3 : index
    %c0_17 = arith.constant 0 : index
    %c0_18 = arith.constant 0 : index
    %16 = vector.load %arg2[%c3, %c0_17, %c0_18] : memref<9x8x4xf32, #tpu.memory_space<vmem>>, vector<1x8x4xf32>
    %17 = vector.shape_cast %16 : vector<1x8x4xf32> to vector<8x4xf32>
    %cst_19 = arith.constant dense<0.000000e+00> : vector<8x648xf32>
    %18 = tpu.matmul %17, %15, %cst_19 {dimension_numbers = #tpu.dot_dimension_numbers<[1], [0], [0], [1], [0, 0, 1, 1], [], []>} : vector<8x4xf32>, vector<4x648xf32>, vector<8x648xf32> -> vector<8x648xf32>
    %19 = arith.addf %14, %18 : vector<8x648xf32>
    %c0_20 = arith.constant 0 : index
    %c19 = arith.constant 19 : index
    %20 = vector.load %arg1[%c0_20, %c19] : memref<4x686xf32, #tpu.memory_space<vmem>>, vector<4x648xf32>
    %c4 = arith.constant 4 : index
    %c0_21 = arith.constant 0 : index
    %c0_22 = arith.constant 0 : index
    %21 = vector.load %arg2[%c4, %c0_21, %c0_22] : memref<9x8x4xf32, #tpu.memory_space<vmem>>, vector<1x8x4xf32>
    %22 = vector.shape_cast %21 : vector<1x8x4xf32> to vector<8x4xf32>
    %cst_23 = arith.constant dense<0.000000e+00> : vector<8x648xf32>
    %23 = tpu.matmul %22, %20, %cst_23 {dimension_numbers = #tpu.dot_dimension_numbers<[1], [0], [0], [1], [0, 0, 1, 1], [], []>} : vector<8x4xf32>, vector<4x648xf32>, vector<8x648xf32> -> vector<8x648xf32>
    %24 = arith.addf %19, %23 : vector<8x648xf32>
    %c0_24 = arith.constant 0 : index
    %c20 = arith.constant 20 : index
    %25 = vector.load %arg1[%c0_24, %c20] : memref<4x686xf32, #tpu.memory_space<vmem>>, vector<4x648xf32>
    %c5 = arith.constant 5 : index
    %c0_25 = arith.constant 0 : index
    %c0_26 = arith.constant 0 : index
    %26 = vector.load %arg2[%c5, %c0_25, %c0_26] : memref<9x8x4xf32, #tpu.memory_space<vmem>>, vector<1x8x4xf32>
    %27 = vector.shape_cast %26 : vector<1x8x4xf32> to vector<8x4xf32>
    %cst_27 = arith.constant dense<0.000000e+00> : vector<8x648xf32>
    %28 = tpu.matmul %27, %25, %cst_27 {dimension_numbers = #tpu.dot_dimension_numbers<[1], [0], [0], [1], [0, 0, 1, 1], [], []>} : vector<8x4xf32>, vector<4x648xf32>, vector<8x648xf32> -> vector<8x648xf32>
    %29 = arith.addf %24, %28 : vector<8x648xf32>
    %c0_28 = arith.constant 0 : index
    %c36 = arith.constant 36 : index
    %30 = vector.load %arg1[%c0_28, %c36] : memref<4x686xf32, #tpu.memory_space<vmem>>, vector<4x648xf32>
    %c6 = arith.constant 6 : index
    %c0_29 = arith.constant 0 : index
    %c0_30 = arith.constant 0 : index
    %31 = vector.load %arg2[%c6, %c0_29, %c0_30] : memref<9x8x4xf32, #tpu.memory_space<vmem>>, vector<1x8x4xf32>
    %32 = vector.shape_cast %31 : vector<1x8x4xf32> to vector<8x4xf32>
    %cst_31 = arith.constant dense<0.000000e+00> : vector<8x648xf32>
    %33 = tpu.matmul %32, %30, %cst_31 {dimension_numbers = #tpu.dot_dimension_numbers<[1], [0], [0], [1], [0, 0, 1, 1], [], []>} : vector<8x4xf32>, vector<4x648xf32>, vector<8x648xf32> -> vector<8x648xf32>
    %34 = arith.addf %29, %33 : vector<8x648xf32>
    %c0_32 = arith.constant 0 : index
    %c37 = arith.constant 37 : index
    %35 = vector.load %arg1[%c0_32, %c37] : memref<4x686xf32, #tpu.memory_space<vmem>>, vector<4x648xf32>
    %c7 = arith.constant 7 : index
    %c0_33 = arith.constant 0 : index
    %c0_34 = arith.constant 0 : index
    %36 = vector.load %arg2[%c7, %c0_33, %c0_34] : memref<9x8x4xf32, #tpu.memory_space<vmem>>, vector<1x8x4xf32>
    %37 = vector.shape_cast %36 : vector<1x8x4xf32> to vector<8x4xf32>
    %cst_35 = arith.constant dense<0.000000e+00> : vector<8x648xf32>
    %38 = tpu.matmul %37, %35, %cst_35 {dimension_numbers = #tpu.dot_dimension_numbers<[1], [0], [0], [1], [0, 0, 1, 1], [], []>} : vector<8x4xf32>, vector<4x648xf32>, vector<8x648xf32> -> vector<8x648xf32>
    %39 = arith.addf %34, %38 : vector<8x648xf32>
    %c0_36 = arith.constant 0 : index
    %c38 = arith.constant 38 : index
    %40 = vector.load %arg1[%c0_36, %c38] : memref<4x686xf32, #tpu.memory_space<vmem>>, vector<4x648xf32>
    %c8 = arith.constant 8 : index
    %c0_37 = arith.constant 0 : index
    %c0_38 = arith.constant 0 : index
    %41 = vector.load %arg2[%c8, %c0_37, %c0_38] : memref<9x8x4xf32, #tpu.memory_space<vmem>>, vector<1x8x4xf32>
    %42 = vector.shape_cast %41 : vector<1x8x4xf32> to vector<8x4xf32>
    %cst_39 = arith.constant dense<0.000000e+00> : vector<8x648xf32>
    %43 = tpu.matmul %42, %40, %cst_39 {dimension_numbers = #tpu.dot_dimension_numbers<[1], [0], [0], [1], [0, 0, 1, 1], [], []>} : vector<8x4xf32>, vector<4x648xf32>, vector<8x648xf32> -> vector<8x648xf32>
    %44 = arith.addf %39, %43 : vector<8x648xf32>
    %45 = vector.broadcast %0 : vector<1x648xf32> to vector<8x648xf32>
    %46 = arith.mulf %44, %45 : vector<8x648xf32>
    %cst_40 = arith.constant dense<0.000000e+00> : vector<8xf32>
    %47 = vector.multi_reduction <add>, %46, %cst_40 [1] : vector<8x648xf32> to vector<8xf32>
    %48 = vector.shape_cast %47 : vector<8xf32> to vector<8x1xf32>
    %49 = arith.mulf %46, %44 : vector<8x648xf32>
    %cst_41 = arith.constant dense<0.000000e+00> : vector<8xf32>
    %50 = vector.multi_reduction <add>, %49, %cst_41 [1] : vector<8x648xf32> to vector<8xf32>
    %51 = vector.shape_cast %50 : vector<8xf32> to vector<8x1xf32>
    %cst_42 = arith.constant 0.001953125 : f32
    %52 = vector.broadcast %cst_42 : f32 to vector<8x1xf32>
    %53 = arith.mulf %48, %52 : vector<8x1xf32>
    %cst_43 = arith.constant 0.001953125 : f32
    %54 = vector.broadcast %cst_43 : f32 to vector<8x1xf32>
    %55 = arith.mulf %51, %54 : vector<8x1xf32>
    %56 = arith.mulf %53, %53 : vector<8x1xf32>
    %57 = arith.subf %55, %56 : vector<8x1xf32>
    %cst_44 = arith.constant 9.99999974E-6 : f32
    %58 = vector.broadcast %cst_44 : f32 to vector<8x1xf32>
    %59 = arith.addf %57, %58 : vector<8x1xf32>
    %60 = math.rsqrt %59 : vector<8x1xf32>
    %c0_45 = arith.constant 0 : index
    %c0_46 = arith.constant 0 : index
    %61 = vector.load %arg3[%c0_45, %c0_46] : memref<8x1xf32, #tpu.memory_space<vmem>>, vector<8x1xf32>
    %62 = arith.mulf %60, %61 : vector<8x1xf32>
    %c0_47 = arith.constant 0 : index
    %c0_48 = arith.constant 0 : index
    %63 = vector.load %arg4[%c0_47, %c0_48] : memref<8x1xf32, #tpu.memory_space<vmem>>, vector<8x1xf32>
    %64 = arith.mulf %53, %62 : vector<8x1xf32>
    %65 = arith.subf %63, %64 : vector<8x1xf32>
    %66 = vector.broadcast %62 : vector<8x1xf32> to vector<8x648xf32>
    %67 = arith.mulf %44, %66 : vector<8x648xf32>
    %68 = vector.broadcast %65 : vector<8x1xf32> to vector<8x648xf32>
    %69 = arith.addf %67, %68 : vector<8x648xf32>
    %cst_49 = arith.constant 0.000000e+00 : f32
    %70 = vector.broadcast %cst_49 : f32 to vector<8x648xf32>
    %71 = arith.maximumf %69, %70 : vector<8x648xf32>
    %c0_50 = arith.constant 0 : index
    %c0_51 = arith.constant 0 : index
    %72 = vector.load %arg6[%c0_50, %c0_51] : memref<8x648xf32, #tpu.memory_space<vmem>>, vector<8x648xf32>
    tpu.vector_store %arg6[%c0_50, %c0_51], %71 {strides = array<i32>} : memref<8x648xf32, #tpu.memory_space<vmem>>, vector<8x648xf32>,
    return
  }
  func.func @transform_0(%arg0: i32) -> (i32, i32) {
    %c0_i32 = arith.constant 0 : i32
    %c0_i32_0 = arith.constant 0 : i32
    %c0_i32_1 = arith.constant 0 : i32
    return %c0_i32, %c0_i32_0 : i32, i32
  }
  func.func @transform_1(%arg0: i32) -> (i32, i32, i32) {
    %c0_i32 = arith.constant 0 : i32
    %c0_i32_0 = arith.constant 0 : i32
    %c0_i32_1 = arith.constant 0 : i32
    return %c0_i32, %arg0, %c0_i32_0 : i32, i32, i32
  }
  func.func @transform_2(%arg0: i32) -> (i32, i32) {
    %c0_i32 = arith.constant 0 : i32
    %c0_i32_0 = arith.constant 0 : i32
    return %arg0, %c0_i32 : i32, i32
  }
  func.func @transform_3(%arg0: i32) -> (i32, i32) {
    %c0_i32 = arith.constant 0 : i32
    %c0_i32_0 = arith.constant 0 : i32
    return %arg0, %c0_i32 : i32, i32
  }
  func.func @transform_4(%arg0: i32) -> (i32, i32) {
    %c0_i32 = arith.constant 0 : i32
    %c0_i32_0 = arith.constant 0 : i32
    %c0_i32_1 = arith.constant 0 : i32
    return %c0_i32, %c0_i32_0 : i32, i32
  }
  func.func @transform_5(%arg0: i32) -> (i32, i32) {
    %c0_i32 = arith.constant 0 : i32
    %c0_i32_0 = arith.constant 0 : i32
    return %arg0, %c0_i32 : i32, i32
  }
}

</mosaic_0001>

<bundles_post_ra>
// kernel: tpu_custom_call.1
= control target key start
LH: loop header
LB: loop body
LE: loop exit
PB: predicated region body
PF: predicated region fallthrough
CT: control target
= control target key end

     0   :  { %s2599_s22 = smov 127   ;;  %s2929_s0 = inlined_call_operand.vmem [shape: f32[4,686], index: 0, kind: input, shape index: {}]   ;;  %s2930_s1 = inlined_call_operand.vmem [shape: f32[9,8,4], index: 1, kind: input, shape index: {}]   ;;  %s2931_s2 = inlined_call_operand.vmem [shape: f32[8,1], index: 2, kind: input, shape index: {}]   ;;  %s2932_s3 = inlined_call_operand.vmem [shape: f32[8,1], index: 3, kind: input, shape index: {}]   ;;  %s2933_s4 = inlined_call_operand.vmem [shape: f32[1,648], index: 4, kind: input, shape index: {}]   ;;  %s2934_s5 = inlined_call_operand.hbm [shape: f32[8,648], index: 5, kind: output, shape index: {}]  }
   0x1   :  { %v2643_v0 = vld [vmem:[%s2929_s0] sm:$0xff]  ;;  %v2648_v1 = vld [vmem:[%s2929_s0 + $0x8] sm:$0xff] }
   0x2   :  { %34 = vrot.lane.b32.xlu1 %v2643_v0, %s2599_s22  ;;  %v2653_v2 = vcombine.high %v2643_v0, %v2643_v0  ;;  %v2657_v3 = vcombine.high %v2648_v1, %v2648_v1 }
   0x3   :  { %10 = vsyncpa [#allocation3], 0  ;;  %v2662_v4 = vld [vmem:[%s2929_s0 + $0x10] sm:$0xff]  ;;  %v2600_v5 = vmov 0.0   ;;  %s2601_s0 = smov 126   ;;  %s2602_s25 = smov 110  }
   0x4   :  { %36 = vrot.lane.b32.xlu0 %v2653_v2, %s2599_s22  ;;  %133 = vmatprep.mubr.f32.mxu0 %v2600_v5  ;;  %v2670_v6 = vcombine.high %v2662_v4, %v2662_v4  ;;  %s2603_s26 = smov 109   ;;  %s2604_s27 = smov 108   ;;  %vm46_vm0 = vcmask 1039360   ;;  %vm56_vm1 = vcmask 1043456   ;;  %v2470_v12 = vld [vmem:[%s2930_s1 + $0x8] sm:$0xff]  ;;  %vm52_vm2 = vcmask 31744  }
   0x5   :  { %204 = vmatprep.mubr.f32.mxu1 %v2600_v5  ;;  %s2605_s28 = smov 92   ;;  %s2606_s29 = smov 91   ;;  %vm533_vm3 = vcmask 1031168   ;;  %v25_v22 = vld [vmem:[%s2930_s1] sm:$0xff]  ;;  %v2489_v26 = vld [vmem:[%s2930_s1 + $0x10] sm:$0xff]  ;;  %vm796_vm4 = vcmask 900096  }
   0x6   :  { %40 = vrot.lane.b32.xlu1 %v2657_v3, %s2599_s22  ;;  %s2607_s30 = smov 90   ;;  %v2499_v40 = vld [vmem:[%s2930_s1 + $0x18] sm:$0xff]  ;;  %vm1059_vm5 = vcmask 891904   ;;  %v2509_v49 = vld [vmem:[%s2930_s1 + $0x20] sm:$0xff]  ;;  %vm1322_vm6 = vcmask 883712   ;;  %v2519_v63 = vld [vmem:[%s2930_s1 + $0x28] sm:$0xff] }
   0x7   :  { %vm1585_vm7 = vcmask 752640   ;;  %vm1848_vm8 = vcmask 744448   ;;  %vm2111_vm9 = vcmask 736256   ;;  %vm2392_vm10 = vcmask 64512  }
   0x8   :  { %38 = vrot.lane.b32.xlu0 %v2648_v1, %s2599_s22 }
   0xa   :  { %44 = vrot.lane.b32.xlu1 %v2670_v6, %s2599_s22 }
   0xc   :  { %42 = vrot.lane.b32.xlu0 %v2662_v4, %s2599_s22 }
   0xe   :  { %525 = vrot.lane.b32.xlu1 %v2648_v1, %s2601_s0 }
  0x10   :  { %523 = vrot.lane.b32.xlu0 %v2653_v2, %s2601_s0 }
  0x12   :  { %527 = vrot.lane.b32.xlu1 %v2657_v3, %s2601_s0 }
  0x14   :  { %521 = vrot.lane.b32.xlu0 %v2643_v0, %s2601_s0 }
  0x16   :  { %531 = vrot.lane.b32.xlu1 %v2670_v6, %s2601_s0 }
  0x18   :  { %529 = vrot.lane.b32.xlu0 %v2662_v4, %s2601_s0 }
  0x1a   :  { %788 = vrot.lane.b32.xlu1 %v2648_v1, %s2602_s25 }
  0x1c   :  { %786 = vrot.lane.b32.xlu0 %v2653_v2, %s2602_s25 }
  0x1e   :  { %792 = vrot.lane.b32.xlu1 %v2662_v4, %s2602_s25 }
  0x20   :  { %790 = vrot.lane.b32.xlu0 %v2657_v3, %s2602_s25 }
  0x22   :  { %1049 = vrot.lane.b32.xlu1 %v2653_v2, %s2603_s26 }
  0x24   :  { %784 = vrot.lane.b32.xlu0 %v2643_v0, %s2602_s25 }
  0x26   :  { %794 = vrot.lane.b32.xlu1 %v2670_v6, %s2602_s25 }
  0x28   :  { %1051 = vrot.lane.b32.xlu0 %v2648_v1, %s2603_s26 }
  0x2a   :  { %1053 = vrot.lane.b32.xlu1 %v2657_v3, %s2603_s26 }
  0x2c   :  { %1047 = vrot.lane.b32.xlu0 %v2643_v0, %s2603_s26 }
  0x2e   :  { %1057 = vrot.lane.b32.xlu1 %v2670_v6, %s2603_s26 }
  0x30   :  { %1055 = vrot.lane.b32.xlu0 %v2662_v4, %s2603_s26 }
  0x32   :  { %1314 = vrot.lane.b32.xlu1 %v2648_v1, %s2604_s27 }
  0x34   :  { %1312 = vrot.lane.b32.xlu0 %v2653_v2, %s2604_s27 }
  0x36   :  { %1318 = vrot.lane.b32.xlu1 %v2662_v4, %s2604_s27 }
  0x38   :  { %1316 = vrot.lane.b32.xlu0 %v2657_v3, %s2604_s27 }
  0x3a   :  { %1575 = vrot.lane.b32.xlu1 %v2653_v2, %s2605_s28 }
  0x3c   :  { %1310 = vrot.lane.b32.xlu0 %v2643_v0, %s2604_s27 }
  0x3e   :  { %1320 = vrot.lane.b32.xlu1 %v2670_v6, %s2604_s27 }
  0x40   :  { %1577 = vrot.lane.b32.xlu0 %v2648_v1, %s2605_s28 }
  0x42   :  { %1579 = vrot.lane.b32.xlu1 %v2657_v3, %s2605_s28 }
  0x44   :  { %1573 = vrot.lane.b32.xlu0 %v2643_v0, %s2605_s28 }
  0x46   :  { %1583 = vrot.lane.b32.xlu1 %v2670_v6, %s2605_s28 }
  0x48   :  { %1581 = vrot.lane.b32.xlu0 %v2662_v4, %s2605_s28 }
  0x4a   :  { %1840 = vrot.lane.b32.xlu1 %v2648_v1, %s2606_s29 }
  0x4c   :  { %1838 = vrot.lane.b32.xlu0 %v2653_v2, %s2606_s29 }
  0x4e   :  { %1844 = vrot.lane.b32.xlu1 %v2662_v4, %s2606_s29 }
  0x50   :  { %1842 = vrot.lane.b32.xlu0 %v2657_v3, %s2606_s29 }
  0x52   :  { %2101 = vrot.lane.b32.xlu1 %v2653_v2, %s2607_s30 }
  0x54   :  { %1836 = vrot.lane.b32.xlu0 %v2643_v0, %s2606_s29 }
  0x56   :  { %1846 = vrot.lane.b32.xlu1 %v2670_v6, %s2606_s29 }
  0x58   :  { %2103 = vrot.lane.b32.xlu0 %v2648_v1, %s2607_s30 }
  0x5a   :  { %2105 = vrot.lane.b32.xlu1 %v2657_v3, %s2607_s30 }
  0x5c   :  { %2099 = vrot.lane.b32.xlu0 %v2643_v0, %s2607_s30 }
  0x5e   :  { %2109 = vrot.lane.b32.xlu1 %v2670_v6, %s2607_s30 }
  0x60   :  { %2107 = vrot.lane.b32.xlu0 %v2662_v4, %s2607_s30 }
  0x74   :  { %v35_v7 = vpop.permute.xlu1 %34 }
  0x76   :  { %v37_v8 = vpop.permute.xlu0 %36 }
  0x77   :  { %v47_v14 = vsel %vm46_vm0, %v35_v7, %v37_v8 }
  0x78   :  { %v41_v9 = vpop.permute.xlu1 %40 }
  0x7a   :  { %v39_v10 = vpop.permute.xlu0 %38 }
  0x7b   :  { %v48_v11 = vsel %vm46_vm0, %v37_v8, %v39_v10  ;;  %v49_v19 = vsel %vm46_vm0, %v39_v10, %v41_v9  ;;  %v2529_v10 = vld [vmem:[%s2930_s1 + $0x30] sm:$0xff] }
  0x7c   :  { %v45_v13 = vpop.permute.xlu1 %44  ;;  %2471 = vmatprep.subr.msk.mxu0 %vm56_vm1, %v48_v11 }
  0x7d   :  { %2472 = vmatpush1.msk.msra.mxu0 %vm56_vm1, %v47_v14 }
  0x7e   :  { %v43_v15 = vpop.permute.xlu0 %42  ;;  %2473 = vmatmul.mubr.msk.f32.vlgmr.msra.gmra.mxu0 %vm52_vm2, %v2470_v12  ;;  %2477 = vmatprep.subr.msk.mxu0 %vm56_vm1, %v45_v13 }
  0x7f   :  { %v51_v16 = vsel %vm46_vm0, %v43_v15, %v45_v13  ;;  %v50_v17 = vsel %vm46_vm0, %v41_v9, %v43_v15  ;;  %275 = vmatprep.mubr.f32.mxu0 %v2600_v5 }
  0x80   :  { %v526_v18 = vpop.permute.xlu1 %525  ;;  %2474 = vmatprep.subr.msk.mxu1 %vm56_vm1, %v50_v17  ;;  %2478 = vmatpush1.msk.msra.mxu0 %vm56_vm1, %v51_v16 }
  0x81   :  { %2475 = vmatpush1.msk.msra.mxu1 %vm56_vm1, %v49_v19  ;;  %2483 = vmatprep.subr.msk.mxu0 %vm56_vm1, %v2657_v3 }
  0x82   :  { %v524_v20 = vpop.permute.xlu0 %523  ;;  %2479 = vmatmul.mubr.msk.f32.vlgmr.msra.gmra.mxu0 %vm52_vm2, %v2470_v12  ;;  %2476 = vmatmul.mubr.msk.f32.vlgmr.msra.gmra.mxu1 %vm52_vm2, %v2470_v12 }
  0x83   :  { %v535_v21 = vsel %vm533_vm3, %v524_v20, %v526_v18  ;;  %2484 = vmatpush1.msk.msra.mxu0 %vm56_vm1, %v2648_v1  ;;  %2480 = vmatprep.subr.msk.mxu1 %vm56_vm1, %v2653_v2 }
  0x84   :  { %v528_v23 = vpop.permute.xlu1 %527  ;;  %2490 = vmatprep.subr.msk.mxu0 %vm56_vm1, %v535_v21  ;;  %432 = vmatprep.mubr.f32.mxu0 %v2600_v5 }
  0x85   :  { %2481 = vmatpush1.msk.msra.mxu1 %vm56_vm1, %v2643_v0  ;;  %361 = vmatprep.mubr.f32.mxu1 %v2600_v5  ;;  %v536_v31 = vsel %vm533_vm3, %v526_v18, %v528_v23 }
  0x86   :  { %v522_v24 = vpop.permute.xlu0 %521  ;;  %2485 = vmatmul.mubr.msk.f32.vlgmr.msra.gmra.mxu0 %vm52_vm2, %v25_v22  ;;  %2482 = vmatmul.mubr.msk.f32.vlgmr.msra.gmra.mxu1 %vm52_vm2, %v25_v22 }
  0x87   :  { %v534_v25 = vsel %vm533_vm3, %v522_v24, %v524_v20  ;;  %2486 = vmatprep.subr.msk.mxu1 %vm56_vm1, %v2670_v6  ;;  %618 = vmatprep.mubr.f32.mxu0 %v2600_v5  ;;  %v2539_v24 = vld [vmem:[%s2930_s1 + $0x38] sm:$0xff] }
  0x88   :  { %v532_v27 = vpop.permute.xlu1 %531  ;;  %2491 = vmatpush1.msk.msra.mxu0 %vm56_vm1, %v534_v25  ;;  %2487 = vmatpush1.msk.msra.mxu1 %vm56_vm1, %v2662_v4 }
  0x89   :  { %2496 = vmatprep.subr.msk.mxu0 %vm56_vm1, %v532_v27  ;;  %503 = vmatprep.mubr.f32.mxu1 %v2600_v5 }
  0x8a   :  { %v530_v28 = vpop.permute.xlu0 %529  ;;  %2492 = vmatmul.mubr.msk.f32.vlgmr.msra.gmra.mxu0 %vm52_vm2, %v2489_v26  ;;  %2488 = vmatmul.mubr.msk.f32.vlgmr.msra.gmra.mxu1 %vm52_vm2, %v25_v22 }
  0x8b   :  { %v537_v29 = vsel %vm533_vm3, %v528_v23, %v530_v28  ;;  %v538_v30 = vsel %vm533_vm3, %v530_v28, %v532_v27  ;;  %760 = vmatprep.mubr.f32.mxu0 %v2600_v5  ;;  %689 = vmatprep.mubr.f32.mxu1 %v2600_v5 }
  0x8c   :  { %v789_v32 = vpop.permute.xlu1 %788  ;;  %2493 = vmatprep.subr.msk.mxu1 %vm56_vm1, %v537_v29  ;;  %2497 = vmatpush1.msk.msra.mxu0 %vm56_vm1, %v538_v30 }
  0x8d   :  { %2494 = vmatpush1.msk.msra.mxu1 %vm56_vm1, %v536_v31 }
  0x8e   :  { %v787_v33 = vpop.permute.xlu0 %786  ;;  %2498 = vmatmul.mubr.msk.f32.vlgmr.msra.gmra.mxu0 %vm52_vm2, %v2489_v26  ;;  %2495 = vmatmul.mubr.msk.f32.vlgmr.msra.gmra.mxu1 %vm52_vm2, %v2489_v26 }
  0x8f   :  { %v798_v34 = vsel %vm796_vm4, %v787_v33, %v789_v32  ;;  %881 = vmatprep.mubr.f32.mxu1 %v2600_v5  ;;  %952 = vmatprep.mubr.f32.mxu0 %v2600_v5 }
  0x90   :  { %v793_v35 = vpop.permute.xlu1 %792  ;;  %2500 = vmatprep.subr.msk.mxu1 %vm56_vm1, %v798_v34  ;;  %v2549_v34 = vld [vmem:[%s2930_s1 + $0x40] sm:$0xff] }
  0x92   :  { %v791_v36 = vpop.permute.xlu0 %790 }
  0x93   :  { %v799_v37 = vsel %vm796_vm4, %v789_v32, %v791_v36  ;;  %v800_v38 = vsel %vm796_vm4, %v791_v36, %v793_v35 }
  0x94   :  { %v1050_v39 = vpop.permute.xlu1 %1049  ;;  %2503 = vmatprep.subr.msk.mxu0 %vm56_vm1, %v800_v38 }
  0x95   :  { %2504 = vmatpush1.msk.msra.mxu0 %vm56_vm1, %v799_v37 }
  0x96   :  { %v785_v41 = vpop.permute.xlu0 %784  ;;  %2505 = vmatmul.mubr.msk.f32.vlgmr.msra.gmra.mxu0 %vm52_vm2, %v2499_v40 }
  0x97   :  { %v797_v42 = vsel %vm796_vm4, %v785_v41, %v787_v33  ;;  %1144 = vmatprep.mubr.f32.mxu0 %v2600_v5 }
  0x98   :  { %v795_v43 = vpop.permute.xlu1 %794  ;;  %2501 = vmatpush1.msk.msra.mxu1 %vm56_vm1, %v797_v42 }
  0x99   :  { %v801_v44 = vsel %vm796_vm4, %v793_v35, %v795_v43  ;;  %2506 = vmatprep.subr.msk.mxu1 %vm56_vm1, %v795_v43  ;;  %2502 = vmatmul.mubr.msk.f32.vlgmr.msra.gmra.mxu1 %vm52_vm2, %v2499_v40 }
  0x9a   :  { %2507 = vmatpush1.msk.msra.mxu1 %vm56_vm1, %v801_v44  ;;  %v1052_v45 = vpop.permute.xlu0 %1051  ;;  %1023 = vmatprep.mubr.f32.mxu1 %v2600_v5 }
  0x9b   :  { %v1061_v46 = vsel %vm1059_vm5, %v1050_v39, %v1052_v45 }
  0x9c   :  { %v1054_v47 = vpop.permute.xlu1 %1053  ;;  %2510 = vmatprep.subr.msk.mxu0 %vm56_vm1, %v1061_v46 }
  0x9d   :  { %2508 = vmatmul.mubr.msk.f32.vlgmr.msra.gmra.mxu1 %vm52_vm2, %v2499_v40  ;;  %v1062_v55 = vsel %vm1059_vm5, %v1052_v45, %v1054_v47 }
  0x9e   :  { %v1048_v48 = vpop.permute.xlu0 %1047  ;;  %1215 = vmatprep.mubr.f32.mxu1 %v2600_v5 }
  0x9f   :  { %v1060_v50 = vsel %vm1059_vm5, %v1048_v48, %v1050_v39 }
  0xa0   :  { %v1058_v51 = vpop.permute.xlu1 %1057  ;;  %2511 = vmatpush1.msk.msra.mxu0 %vm56_vm1, %v1060_v50 }
  0xa1   :  { %2516 = vmatprep.subr.msk.mxu0 %vm56_vm1, %v1058_v51  ;;  %2512 = vmatmul.mubr.msk.f32.vlgmr.msra.gmra.mxu0 %vm52_vm2, %v2509_v49 }
  0xa2   :  { %v1056_v52 = vpop.permute.xlu0 %1055  ;;  %1286 = vmatprep.mubr.f32.mxu0 %v2600_v5 }
  0xa3   :  { %v1063_v53 = vsel %vm1059_vm5, %v1054_v47, %v1056_v52  ;;  %v1064_v54 = vsel %vm1059_vm5, %v1056_v52, %v1058_v51 }
  0xa4   :  { %v1315_v56 = vpop.permute.xlu1 %1314  ;;  %2513 = vmatprep.subr.msk.mxu1 %vm56_vm1, %v1063_v53  ;;  %2517 = vmatpush1.msk.msra.mxu0 %vm56_vm1, %v1064_v54 }
  0xa5   :  { %2514 = vmatpush1.msk.msra.mxu1 %vm56_vm1, %v1062_v55  ;;  %2518 = vmatmul.mubr.msk.f32.vlgmr.msra.gmra.mxu0 %vm52_vm2, %v2509_v49 }
  0xa6   :  { %v1313_v57 = vpop.permute.xlu0 %1312  ;;  %2515 = vmatmul.mubr.msk.f32.vlgmr.msra.gmra.mxu1 %vm52_vm2, %v2509_v49  ;;  %1478 = vmatprep.mubr.f32.mxu0 %v2600_v5 }
  0xa7   :  { %v1324_v58 = vsel %vm1322_vm6, %v1313_v57, %v1315_v56  ;;  %1407 = vmatprep.mubr.f32.mxu1 %v2600_v5 }
  0xa8   :  { %v1319_v59 = vpop.permute.xlu1 %1318  ;;  %2520 = vmatprep.subr.msk.mxu1 %vm56_vm1, %v1324_v58 }
  0xaa   :  { %v1317_v60 = vpop.permute.xlu0 %1316 }
  0xab   :  { %v1325_v61 = vsel %vm1322_vm6, %v1315_v56, %v1317_v60  ;;  %v1326_v62 = vsel %vm1322_vm6, %v1317_v60, %v1319_v59 }
  0xac   :  { %v1576_v0 = vpop.permute.xlu1 %1575  ;;  %2523 = vmatprep.subr.msk.mxu0 %vm56_vm1, %v1326_v62 }
  0xad   :  { %2524 = vmatpush1.msk.msra.mxu0 %vm56_vm1, %v1325_v61 }
  0xae   :  { %v1311_v1 = vpop.permute.xlu0 %1310  ;;  %2525 = vmatmul.mubr.msk.f32.vlgmr.msra.gmra.mxu0 %vm52_vm2, %v2519_v63 }
  0xaf   :  { %v1323_v2 = vsel %vm1322_vm6, %v1311_v1, %v1313_v57  ;;  %1670 = vmatprep.mubr.f32.mxu0 %v2600_v5 }
  0xb0   :  { %v1321_v3 = vpop.permute.xlu1 %1320  ;;  %2521 = vmatpush1.msk.msra.mxu1 %vm56_vm1, %v1323_v2 }
  0xb1   :  { %v1327_v4 = vsel %vm1322_vm6, %v1319_v59, %v1321_v3  ;;  %2522 = vmatmul.mubr.msk.f32.vlgmr.msra.gmra.mxu1 %vm52_vm2, %v2519_v63  ;;  %2526 = vmatprep.subr.msk.mxu1 %vm56_vm1, %v1321_v3 }
  0xb2   :  { %2527 = vmatpush1.msk.msra.mxu1 %vm56_vm1, %v1327_v4  ;;  %v1578_v6 = vpop.permute.xlu0 %1577  ;;  %1549 = vmatprep.mubr.f32.mxu1 %v2600_v5 }
  0xb3   :  { %v1587_v7 = vsel %vm1585_vm7, %v1576_v0, %v1578_v6 }
  0xb4   :  { %v1580_v8 = vpop.permute.xlu1 %1579  ;;  %2530 = vmatprep.subr.msk.mxu0 %vm56_vm1, %v1587_v7 }
  0xb5   :  { %2528 = vmatmul.mubr.msk.f32.vlgmr.msra.gmra.mxu1 %vm52_vm2, %v2519_v63  ;;  %v1588_v16 = vsel %vm1585_vm7, %v1578_v6, %v1580_v8 }
  0xb6   :  { %v1574_v9 = vpop.permute.xlu0 %1573  ;;  %1741 = vmatprep.mubr.f32.mxu1 %v2600_v5 }
  0xb7   :  { %v1586_v11 = vsel %vm1585_vm7, %v1574_v9, %v1576_v0 }
  0xb8   :  { %v1584_v12 = vpop.permute.xlu1 %1583  ;;  %2531 = vmatpush1.msk.msra.mxu0 %vm56_vm1, %v1586_v11 }
  0xb9   :  { %2532 = vmatmul.mubr.msk.f32.vlgmr.msra.gmra.mxu0 %vm52_vm2, %v2529_v10  ;;  %2536 = vmatprep.subr.msk.mxu0 %vm56_vm1, %v1584_v12 }
  0xba   :  { %v1582_v13 = vpop.permute.xlu0 %1581  ;;  %1812 = vmatprep.mubr.f32.mxu0 %v2600_v5 }
  0xbb   :  { %v1589_v14 = vsel %vm1585_vm7, %v1580_v8, %v1582_v13  ;;  %v1590_v15 = vsel %vm1585_vm7, %v1582_v13, %v1584_v12 }
  0xbc   :  { %v1841_v17 = vpop.permute.xlu1 %1840  ;;  %2533 = vmatprep.subr.msk.mxu1 %vm56_vm1, %v1589_v14  ;;  %2537 = vmatpush1.msk.msra.mxu0 %vm56_vm1, %v1590_v15 }
  0xbd   :  { %2534 = vmatpush1.msk.msra.mxu1 %vm56_vm1, %v1588_v16  ;;  %2538 = vmatmul.mubr.msk.f32.vlgmr.msra.gmra.mxu0 %vm52_vm2, %v2529_v10 }
  0xbe   :  { %2535 = vmatmul.mubr.msk.f32.vlgmr.msra.gmra.mxu1 %vm52_vm2, %v2529_v10  ;;  %v1839_v18 = vpop.permute.xlu0 %1838  ;;  %2004 = vmatprep.mubr.f32.mxu0 %v2600_v5 }
  0xbf   :  { %v1850_v19 = vsel %vm1848_vm8, %v1839_v18, %v1841_v17  ;;  %1933 = vmatprep.mubr.f32.mxu1 %v2600_v5 }
  0xc0   :  { %v1845_v20 = vpop.permute.xlu1 %1844  ;;  %2540 = vmatprep.subr.msk.mxu1 %vm56_vm1, %v1850_v19 }
  0xc2   :  { %v1843_v21 = vpop.permute.xlu0 %1842 }
  0xc3   :  { %v1851_v22 = vsel %vm1848_vm8, %v1841_v17, %v1843_v21  ;;  %v1852_v23 = vsel %vm1848_vm8, %v1843_v21, %v1845_v20  ;;  %v2352_v21 = vlaneseq }
  0xc4   :  { %v2102_v25 = vpop.permute.xlu1 %2101  ;;  %2543 = vmatprep.subr.msk.mxu0 %vm56_vm1, %v1852_v23 }
  0xc5   :  { %2544 = vmatpush1.msk.msra.mxu0 %vm56_vm1, %v1851_v22 }
  0xc6   :  { %2545 = vmatmul.mubr.msk.f32.vlgmr.msra.gmra.mxu0 %vm52_vm2, %v2539_v24  ;;  %v1837_v26 = vpop.permute.xlu0 %1836 }
  0xc7   :  { %v1849_v27 = vsel %vm1848_vm8, %v1837_v26, %v1839_v18  ;;  %2196 = vmatprep.mubr.f32.mxu0 %v2600_v5 }
  0xc8   :  { %v1847_v28 = vpop.permute.xlu1 %1846  ;;  %2541 = vmatpush1.msk.msra.mxu1 %vm56_vm1, %v1849_v27 }
  0xc9   :  { %v1853_v29 = vsel %vm1848_vm8, %v1845_v20, %v1847_v28  ;;  %2542 = vmatmul.mubr.msk.f32.vlgmr.msra.gmra.mxu1 %vm52_vm2, %v2539_v24  ;;  %2546 = vmatprep.subr.msk.mxu1 %vm56_vm1, %v1847_v28 }
  0xca   :  { %2547 = vmatpush1.msk.msra.mxu1 %vm56_vm1, %v1853_v29  ;;  %v2104_v30 = vpop.permute.xlu0 %2103  ;;  %2075 = vmatprep.mubr.f32.mxu1 %v2600_v5 }
  0xcb   :  { %v2113_v31 = vsel %vm2111_vm9, %v2102_v25, %v2104_v30 }
  0xcc   :  { %v2106_v32 = vpop.permute.xlu1 %2105  ;;  %2550 = vmatprep.subr.msk.mxu0 %vm56_vm1, %v2113_v31 }
  0xcd   :  { %2548 = vmatmul.mubr.msk.f32.vlgmr.msra.gmra.mxu1 %vm52_vm2, %v2539_v24  ;;  %v2114_v40 = vsel %vm2111_vm9, %v2104_v30, %v2106_v32  ;;  %v2896_v30 = vshrl.u32 %v2352_v21, 7 }
  0xce   :  { %v2100_v33 = vpop.permute.xlu0 %2099  ;;  %2267 = vmatprep.mubr.f32.mxu1 %v2600_v5 }
  0xcf   :  { %v2112_v35 = vsel %vm2111_vm9, %v2100_v33, %v2102_v25 }
  0xd0   :  { %2551 = vmatpush1.msk.msra.mxu0 %vm56_vm1, %v2112_v35  ;;  %v2110_v36 = vpop.permute.xlu1 %2109 }
  0xd1   :  { %2552 = vmatmul.mubr.msk.f32.vlgmr.msra.gmra.mxu0 %vm52_vm2, %v2549_v34  ;;  %2556 = vmatprep.subr.msk.mxu0 %vm56_vm1, %v2110_v36 }
  0xd2   :  { %v2108_v37 = vpop.permute.xlu0 %2107  ;;  %2338 = vmatprep.mubr.f32.mxu0 %v2600_v5 }
  0xd3   :  { %v2115_v38 = vsel %vm2111_vm9, %v2106_v32, %v2108_v37  ;;  %v2116_v39 = vsel %vm2111_vm9, %v2108_v37, %v2110_v36 }
  0xd4   :  { %2553 = vmatprep.subr.msk.mxu1 %vm56_vm1, %v2115_v38  ;;  %2557 = vmatpush1.msk.msra.mxu0 %vm56_vm1, %v2116_v39 }
  0xd5   :  { %2554 = vmatpush1.msk.msra.mxu1 %vm56_vm1, %v2114_v40  ;;  %2558 = vmatmul.mubr.msk.f32.vlgmr.msra.gmra.mxu0 %vm52_vm2, %v2549_v34 }
  0xd6   :  { %2555 = vmatmul.mubr.msk.f32.vlgmr.msra.gmra.mxu1 %vm52_vm2, %v2549_v34 }
 0x13e   :  { %v135_v41 = vpop.f32.mrf.mxu0 }
 0x140   :  { %v137_v42 = vpop.f32.mrf.mxu0 }
 0x142   :  { %v277_v43 = vpop.f32.mrf.mxu0  ;;  %v206_v5 = vpop.f32.mrf.mxu1 }
 0x144   :  { %v279_v44 = vpop.f32.mrf.mxu0  ;;  %v208_v45 = vpop.f32.mrf.mxu1 }
 0x146   :  { %v434_v46 = vpop.f32.mrf.mxu0  ;;  %v363_v47 = vpop.f32.mrf.mxu1 }
 0x147   :  { %v364_v13 = vadd.f32 %v363_v47, %v135_v41  ;;  %v435_v15 = vadd.f32 %v434_v46, %v206_v5  ;;  %v2354_v41 = vsub.s32 0, %v2896_v30 }
 0x148   :  { %v436_v48 = vpop.f32.mrf.mxu0  ;;  %v365_v49 = vpop.f32.mrf.mxu1 }
 0x149   :  { %v366_v14 = vadd.f32 %v365_v49, %v137_v42  ;;  %v437_v24 = vadd.f32 %v436_v48, %v208_v45  ;;  %v2358_v42 = vsub.s32 1, %v2896_v30  ;;  %v21_v45 = vld [vmem:[%s2933_s4] sm:$0x3f] }
 0x14a   :  { %v620_v50 = vpop.f32.mrf.mxu0  ;;  %v505_v51 = vpop.f32.mrf.mxu1 }
 0x14b   :  { %v767_v18 = vadd.f32 %v620_v50, %v364_v13  ;;  %v506_v19 = vadd.f32 %v505_v51, %v277_v43 }
 0x14c   :  { %v622_v52 = vpop.f32.mrf.mxu0  ;;  %v507_v53 = vpop.f32.mrf.mxu1 }
 0x14d   :  { %v768_v22 = vadd.f32 %v622_v52, %v366_v14  ;;  %v508_v23 = vadd.f32 %v507_v53, %v279_v44  ;;  %v2355_v53 = vrot.slane %v21_v45, %v2354_v41  ;;  %v2366_v14 = vsub.s32 3, %v2896_v30 }
 0x14e   :  { %v762_v54 = vpop.f32.mrf.mxu0  ;;  %v691_v55 = vpop.f32.mrf.mxu1 }
 0x14f   :  { %v769_v25 = vadd.f32 %v691_v55, %v435_v15  ;;  %v771_v28 = vadd.f32 %v762_v54, %v506_v19  ;;  %v2359_v54 = vrot.slane %v21_v45, %v2358_v42 }
 0x150   :  { %v764_v56 = vpop.f32.mrf.mxu0  ;;  %v693_v57 = vpop.f32.mrf.mxu1 }
 0x151   :  { %v772_v31 = vadd.f32 %v764_v56, %v508_v23  ;;  %v770_v33 = vadd.f32 %v693_v57, %v437_v24 }
 0x156   :  { %v954_v58 = vpop.f32.mrf.mxu0 }
 0x157   :  { %v1032_v34 = vadd.f32 %v954_v58, %v769_v25  ;;  %v2370_v58 = vsub.s32 4, %v2896_v30 }
 0x158   :  { %v956_v60 = vpop.f32.mrf.mxu0 }
 0x159   :  { %v883_v59 = vpop.f32.mrf.mxu1  ;;  %v1033_v46 = vadd.f32 %v956_v60, %v770_v33 }
 0x15a   :  { %v1030_v27 = vadd.f32 %v883_v59, %v767_v18 }
 0x15b   :  { %v885_v61 = vpop.f32.mrf.mxu1 }
 0x15c   :  { %v1031_v32 = vadd.f32 %v885_v61, %v768_v22 }
 0x15d   :  { %v1025_v63 = vpop.f32.mrf.mxu1 }
 0x15e   :  { %v1034_v38 = vadd.f32 %v1025_v63, %v771_v28  ;;  %v2367_v28 = vrot.slane %v21_v45, %v2366_v14 }
 0x15f   :  { %v1027_v1 = vpop.f32.mrf.mxu1 }
 0x160   :  { %v1035_v5 = vadd.f32 %v1027_v1, %v772_v31 }
 0x161   :  { %v1146_v62 = vpop.f32.mrf.mxu0 }
 0x162   :  { %v1293_v37 = vadd.f32 %v1146_v62, %v1030_v27 }
 0x163   :  { %v1148_v0 = vpop.f32.mrf.mxu0 }
 0x164   :  { %v1294_v43 = vadd.f32 %v1148_v0, %v1031_v32  ;;  %v2362_v0 = vsub.s32 2, %v2896_v30 }
 0x165   :  { %v1288_v2 = vpop.f32.mrf.mxu0 }
 0x166   :  { %v1217_v3 = vpop.f32.mrf.mxu1  ;;  %v1297_v50 = vadd.f32 %v1288_v2, %v1034_v38  ;;  %v2374_v2 = vsub.s32 5, %v2896_v30  ;;  %v2363_v19 = vrot.slane %v21_v45, %v2362_v0 }
 0x167   :  { %v1290_v4 = vpop.f32.mrf.mxu0  ;;  %v1295_v47 = vadd.f32 %v1217_v3, %v1032_v34 }
 0x168   :  { %v1219_v6 = vpop.f32.mrf.mxu1  ;;  %v1298_v55 = vadd.f32 %v1290_v4, %v1035_v5 }
 0x169   :  { %v1296_v59 = vadd.f32 %v1219_v6, %v1033_v46 }
 0x16e   :  { %v1480_v8 = vpop.f32.mrf.mxu0 }
 0x16f   :  { %v1558_v61 = vadd.f32 %v1480_v8, %v1295_v47 }
 0x170   :  { %v1482_v10 = vpop.f32.mrf.mxu0 }
 0x171   :  { %v1409_v7 = vpop.f32.mrf.mxu1 }
 0x172   :  { %v1556_v44 = vadd.f32 %v1409_v7, %v1293_v37  ;;  %v1559_v7 = vadd.f32 %v1482_v10, %v1296_v59  ;;  %v2371_v10 = vrot.slane %v21_v45, %v2370_v58 }
 0x173   :  { %v1411_v9 = vpop.f32.mrf.mxu1 }
 0x174   :  { %v1557_v48 = vadd.f32 %v1411_v9, %v1294_v43 }
 0x175   :  { %v1551_v11 = vpop.f32.mrf.mxu1 }
 0x176   :  { %v1560_v62 = vadd.f32 %v1551_v11, %v1297_v50 }
 0x177   :  { %v1553_v16 = vpop.f32.mrf.mxu1 }
 0x178   :  { %v1561_v60 = vadd.f32 %v1553_v16, %v1298_v55 }
 0x179   :  { %v1672_v12 = vpop.f32.mrf.mxu0 }
 0x17a   :  { %v1819_v49 = vadd.f32 %v1672_v12, %v1556_v44 }
 0x17b   :  { %v1674_v17 = vpop.f32.mrf.mxu0 }
 0x17c   :  { %v1820_v56 = vadd.f32 %v1674_v17, %v1557_v48 }
 0x17d   :  { %v1814_v26 = vpop.f32.mrf.mxu0 }
 0x17e   :  { %v1743_v20 = vpop.f32.mrf.mxu1  ;;  %v1823_v9 = vadd.f32 %v1814_v26, %v1560_v62  ;;  %v2417_v62 = vld [vmem:[%s2931_s2] sm:$0xff]  ;;  %s2609_s2 = smov [#allocation2]  }
 0x17f   :  { %v1816_v35 = vpop.f32.mrf.mxu0  ;;  %v1821_v12 = vadd.f32 %v1743_v20, %v1558_v61  ;;  %v2375_v20 = vrot.slane %v21_v45, %v2374_v2 }
 0x180   :  { %v1745_v29 = vpop.f32.mrf.mxu1  ;;  %v1824_v15 = vadd.f32 %v1816_v35, %v1561_v60  ;;  %v2419_v60 = vld [vmem:[%s2932_s3] sm:$0xff]  ;;  %s2462_s3 = sshll.u32 %s2609_s2, 4  ;;  %s2463_s3 = int_to_ptr.vmem [resolvable:$true] %s2462_s3 }
 0x181   :  { %v1822_v11 = vadd.f32 %v1745_v29, %v1559_v7  ;;  %s2577_s27 = scalar_lea.vmem %s2463_s3, 768  ;;  %p2582_p1 = scmp.lt.s32.totalorder %s2463_s3, %s2463_s3 }
 0x182   :  { %p2578_p0 = scmp.ne.s32.totalorder %s2463_s3, %s2577_s27  ;;  %p2583_p2 = scmp.lt.s32.totalorder %s2577_s27, %s2577_s27 }
 0x184   :  { %p2584_p3 = por %p2583_p2, %p2582_p1 }
 0x186   :  { %v2006_v39 = vpop.f32.mrf.mxu0  ;;  %p2585_p4 = pnand %p2584_p3, %p2578_p0 }
 0x187   :  { %v2084_v17 = vadd.f32 %v2006_v39, %v1821_v12 }
 0x188   :  { %v2008_v51 = vpop.f32.mrf.mxu0 }
 0x189   :  { %v1935_v36 = vpop.f32.mrf.mxu1  ;;  %v2085_v24 = vadd.f32 %v2008_v51, %v1822_v11 }
 0x18a   :  { %v2082_v57 = vadd.f32 %v1935_v36, %v1819_v49 }
 0x18b   :  { %v1937_v40 = vpop.f32.mrf.mxu1 }
 0x18c   :  { %v2083_v1 = vadd.f32 %v1937_v40, %v1820_v56 }
 0x18d   :  { %v2077_v52 = vpop.f32.mrf.mxu1 }
 0x18e   :  { %v2086_v16 = vadd.f32 %v2077_v52, %v1823_v9 }
 0x18f   :  { %v2079_v4 = vpop.f32.mrf.mxu1 }
 0x190   :  { %v2087_v21 = vadd.f32 %v2079_v4, %v1824_v15 }
 0x191   :  { %v2198_v63 = vpop.f32.mrf.mxu0 }
 0x192   :  { %v2905_v3 = vadd.f32 %v2198_v63, %v2082_v57 }
 0x193   :  { %v2200_v13 = vpop.f32.mrf.mxu0 }
 0x194   :  { %v2382_v6 = vmul.f32 %v2355_v53, %v2905_v3  ;;  %v2910_v8 = vadd.f32 %v2200_v13, %v2083_v1  ;;  %v2608_v53 = vmov 0  }
 0x195   :  { %v2340_v18 = vpop.f32.mrf.mxu0  ;;  %2570 = vset.pattern.permute.xlu0 %v2608_v53  ;;  %2571 = vset.pattern.permute.xlu1 %v2608_v53 }
 0x196   :  { %v2383_v22 = vmul.f32 %v2359_v54, %v2910_v8  ;;  %v2269_v23 = vpop.f32.mrf.mxu1  ;;  %v2349_v25 = vadd.f32 %v2340_v18, %v2086_v16  ;;  %v2397_v30 = vmul.f32 %v2382_v6, %v2905_v3 }
 0x197   :  { %v2347_v26 = vadd.f32 %v2269_v23, %v2084_v17  ;;  %v2342_v27 = vpop.f32.mrf.mxu0 }
 0x198   :  { %v2388_v31 = vadd.f32 %v2383_v22, %v2382_v6  ;;  %v2398_v29 = vmul.f32 %v2383_v22, %v2910_v8  ;;  %v2350_v32 = vadd.f32 %v2342_v27, %v2087_v21  ;;  %v2271_v33 = vpop.f32.mrf.mxu1  ;;  %v2386_v38 = vmul.f32 %v2371_v10, %v2349_v25 }
 0x199   :  { %v2384_v34 = vmul.f32 %v2363_v19, %v2347_v26  ;;  %v2348_v35 = vadd.f32 %v2271_v33, %v2085_v24 }
 0x19a   :  { %v2403_v36 = vadd.f32 %v2398_v29, %v2397_v30  ;;  %v2387_v37 = vmul.f32 %v2375_v20, %v2350_v32  ;;  %v2401_v45 = vmul.f32 %v2386_v38, %v2349_v25 }
 0x19b   :  { %v2389_v39 = vadd.f32 %v2388_v31, %v2384_v34  ;;  %v2399_v40 = vmul.f32 %v2384_v34, %v2347_v26  ;;  %v2385_v41 = vmul.f32 %v2367_v28, %v2348_v35 }
 0x19c   :  { %v2402_v44 = vmul.f32 %v2387_v37, %v2350_v32  ;;  %v2393_v48 = vsel %vm2392_vm10, %v2387_v37, 0.0 }
 0x19d   :  { %v2404_v42 = vadd.f32 %v2403_v36, %v2399_v40  ;;  %v2400_v43 = vmul.f32 %v2385_v41, %v2348_v35  ;;  %v2390_v5 = vadd.f32 %v2389_v39, %v2385_v41 }
 0x19e   :  { %v2407_v51 = vsel %vm2392_vm10, %v2402_v44, 0.0 }
 0x19f   :  { %v2391_v46 = vadd.f32 %v2390_v5, %v2386_v38  ;;  %v2405_v47 = vadd.f32 %v2404_v42, %v2400_v43 }
 0x1a1   :  { %v2394_v49 = vadd.f32 %v2393_v48, %v2391_v46  ;;  %v2406_v50 = vadd.f32 %v2405_v47, %v2401_v45 }
 0x1a3   :  { %2395 = vadd.xlane.f32.xlu0 %v2394_v49  ;;  %v2408_v52 = vadd.f32 %v2407_v51, %v2406_v50 }
 0x1a5   :  { %2409 = vadd.xlane.f32.xlu1 %v2408_v52 }
 0x22c   :  { %v2396_v54 = vpop.xlane.xlu0 %2395 }
 0x22d   :  { %v2411_v55 = vmul.f32 0.001953125, %v2396_v54 }
 0x22e   :  { %v2410_v56 = vpop.xlane.xlu1 %2409 }
 0x22f   :  { %v2413_v57 = vmul.f32 %v2411_v55, %v2411_v55  ;;  %v2412_v58 = vmul.f32 0.001953125, %v2410_v56 }
 0x231   :  { %v2414_v59 = vsub.f32 %v2412_v58, %v2413_v57 }
 0x233   :  { %v2415_v61 = vadd.f32 1e-05, %v2414_v59 }
 0x235   :  { %2575 = vrsqrt.f32 %v2415_v61 }
 0x242   :  { %v2576_v63 = vpop.eup %2575 }
 0x243   :  { %v2418_v0 = vmul.f32 %v2576_v63, %v2417_v62 }
 0x245   :  { %2424 = vperm.xlu0 %2570, %v2418_v0   ;;  %v2420_v1 = vmul.f32 %v2418_v0, %v2411_v55 }
 0x247   :  { %v2421_v2 = vsub.f32 %v2419_v60, %v2420_v1 }
 0x249   :  { %2435 = vperm.xlu1 %2571, %v2421_v2  }
 0x2c0   :  { %v2425_v7 = vpop.permute.xlu0 %2424 }
 0x2c1   :  { %v2427_v9 = vmul.f32 %v2425_v7, %v2905_v3  ;;  %v2428_v12 = vmul.f32 %v2425_v7, %v2910_v8  ;;  %v2429_v4 = vmul.f32 %v2425_v7, %v2347_v26  ;;  %v2430_v13 = vmul.f32 %v2425_v7, %v2348_v35 }
 0x2c2   :  { %v2431_v14 = vmul.f32 %v2425_v7, %v2349_v25  ;;  %v2432_v15 = vmul.f32 %v2425_v7, %v2350_v32 }
 0x2c4   :  { %v2436_v6 = vpop.permute.xlu1 %2435 }
 0x2c5   :  { %v2438_v11 = vadd.f32 %v2436_v6, %v2427_v9  ;;  %v2439_v17 = vadd.f32 %v2436_v6, %v2428_v12  ;;  %v2440_v16 = vadd.f32 %v2436_v6, %v2429_v4  ;;  %v2441_v18 = vadd.f32 %v2436_v6, %v2430_v13 }
 0x2c6   :  { %v2442_v19 = vadd.f32 %v2436_v6, %v2431_v14  ;;  %v2443_v21 = vadd.f32 %v2436_v6, %v2432_v15 }
 0x2c7   :  { %v2444_v22 = vmax.f32 %v2438_v11, 0.0  ;;  %v2445_v10 = vmax.f32 %v2439_v17, 0.0  ;;  %v2446_v23 = vmax.f32 %v2440_v16, 0.0  ;;  %v2447_v20 = vmax.f32 %v2441_v18, 0.0 }
 0x2c8   :  { %v2448_v3 = vmax.f32 %v2442_v19, 0.0  ;;  %v2449_v24 = vmax.f32 %v2443_v21, 0.0 }
 0x2c9   :  { %2450 = vst [vmem:[#allocation2] sm:$0xff] %v2444_v22  ;;  %2451 = vst [vmem:[#allocation2 + $0x8] sm:$0xff] %v2445_v10 }
 0x2ca   :  { %2452 = vst [vmem:[#allocation2 + $0x10] sm:$0xff] %v2446_v23  ;;  %2453 = vst [vmem:[#allocation2 + $0x18] sm:$0xff] %v2447_v20 }
 0x2cb   :  { %2454 = vst [vmem:[#allocation2 + $0x20] sm:$0xff] %v2448_v3  ;;  %2455 = vst.msk [vmem:[#allocation2 + $0x28] sm:$0xff] %vm2392_vm10, %v2449_v24 }
 0x2cc   :  { %2588 = shalt.err (!%p2585_p4)
}
 0x2cd   :  { %2465 = dma.vmem_to_hbm [thread:$0]  %s2463_s3, 768, %s2934_s5, [#allocation3]  }
 0x2ce   :  { %2597 = dma.done.wait [#allocation3], 768  }
 0x2cf   :  { %2598 = vsyncadd [#allocation3], 4294966528 }
 0x2d0   :  { %2469 = vsyncpa [#allocation3], 1 }

</bundles_post_ra>
